<compile_context>
chip_gen: v7x
topology: tpu7x:2x2x1
jax: 0.10.0
libtpu: 0.0.40
codegen_flags: <defaults>
</compile_context>

<pallas_src>
import functools

import jax
import jax.numpy as jnp
from jax.experimental import pallas as pl
from jax.experimental.pallas import tpu as pltpu

_LANE = 128


def _round_up(n, m):
    return -(-n // m) * m


def _make_idxsel_kernel(out_pads, options):
    """Kernel refs: (idx, x, w0, b0, w1, b1, ..., out).

    w_l: (in_l, options*out_pads[l]) bf16, options packed along N.
    b_l: (1, out_pads[l]) f32 -- bias is ALWAYS option 0 in the torch forward.
    """
    n_layers = len(out_pads)

    def kernel(idx_ref, x_ref, *refs):
        o_ref = refs[-1]
        wb = refs[:-1]
        idx = idx_ref[...]                        # (TB, 1) int32
        h = x_ref[...]                            # (TB, in0) bf16
        h32 = None
        for l in range(n_layers):
            w = wb[2 * l][...]                    # (in_l, options*out_pad) bf16
            b = wb[2 * l + 1][...]                # (1, out_pad) f32
            out_w = out_pads[l]
            # Single MXU matmul per layer over the options-packed N dim; f32 accumulate.
            y = jnp.dot(h, w, preferred_element_type=jnp.float32)   # (TB, options*out_w)
            # Per-sample option select: lane-aligned (multiple-of-128) static slices + where.
            # idx outside [0, options) falls back to option 0.
            sel = y[:, :out_w]
            for o in range(1, options):
                sel = jnp.where(idx == o, y[:, o * out_w:(o + 1) * out_w], sel)
            h32 = sel + b
            if l + 1 < n_layers:
                h = h32.astype(jnp.bfloat16)      # next layer's MXU operand
        o_ref[...] = h32.astype(o_ref.dtype)

    return kernel


def init_idxsel_mlp_params(key, layers=(256, 128, 64), options=2):
    """Xavier-normal weights, zero biases (matches IdxSelMLP._init_params)."""
    params = []
    for i in range(len(layers) - 1):
        key, kw = jax.random.split(key)
        fan_in, fan_out = layers[i], layers[i + 1]
        std = jnp.sqrt(2.0 / (fan_in + fan_out)).astype(jnp.float32)
        w = jax.random.normal(kw, (options, fan_in, fan_out), dtype=jnp.float32) * std
        b = jnp.zeros((options, fan_out), dtype=jnp.float32)
        params.append((w, b))
    return params


@functools.partial(jax.jit, static_argnames=("block_b", "keep_padded"))
def idxsel_mlp_forward(x, idx, params, block_b=1024, keep_padded=False):
    """x: (B, D_in) f32, idx: (B,) int in [0, options). Returns (B, layers[-1]) f32.

    (In a real pipeline the weight packing below would be done once, outside the step fn.)
    """
    B, d_in = x.shape
    options = params[0][0].shape[0]
    out_dim = params[-1][0].shape[2]
    n_layers = len(params)

    # ---- pack weights: (options, in, out) -> bf16 (in_pad, options*out_pad) --------------
    packed = []
    out_pads = []
    prev_out_pad = d_in
    for li, (w, b) in enumerate(params):
        _, w_in, w_out = w.shape
        out_pad = _round_up(w_out, _LANE)
        in_pad = d_in if li == 0 else prev_out_pad
        w_p = jnp.pad(w.astype(jnp.float32),
                      ((0, 0), (0, in_pad - w_in), (0, out_pad - w_out)))
        w_p = jnp.transpose(w_p, (1, 0, 2)).reshape(in_pad, options * out_pad)
        b_p = jnp.pad(b[0].astype(jnp.float32), (0, out_pad - w_out)).reshape(1, out_pad)
        packed.append((w_p.astype(jnp.bfloat16), b_p))
        out_pads.append(out_pad)
        prev_out_pad = out_pad
    out_pad_last = out_pads[-1]

    # ---- batch tile: big (overhead-amortizing) but with >=2 grid steps for v7x megacore --
    tb = min(block_b, max(8, _round_up(pl.cdiv(B, 2), 8)))
    grid = (pl.cdiv(B, tb),)

    idx2 = idx.reshape(B, 1).astype(jnp.int32)
    x_bf = x.astype(jnp.bfloat16)                 # halve the dominant HBM input stream

    flat_in = [idx2, x_bf]
    in_specs = [
        pl.BlockSpec((tb, 1), lambda i: (i, 0)),
        pl.BlockSpec((tb, d_in), lambda i: (i, 0)),
    ]
    for (w_p, b_p) in packed:
        flat_in += [w_p, b_p]
        in_specs += [
            pl.BlockSpec(w_p.shape, lambda i: (0, 0)),   # VMEM-resident across grid steps
            pl.BlockSpec(b_p.shape, lambda i: (0, 0)),
        ]

    flops = 2 * B * sum(w.shape[0] * w.shape[1] for (w, _) in packed)
    bytes_accessed = (x_bf.size * 2 + idx2.size * 4 + B * out_pad_last * 4
                      + sum(w.size * 2 + b.size * 4 for (w, b) in packed))

    out = pl.pallas_call(
        _make_idxsel_kernel(tuple(out_pads), options),
        out_shape=jax.ShapeDtypeStruct((B, out_pad_last), jnp.float32),
        grid=grid,
        in_specs=in_specs,
        out_specs=pl.BlockSpec((tb, out_pad_last), lambda i: (i, 0)),
        compiler_params=pltpu.CompilerParams(
            dimension_semantics=("parallel",)),
        cost_estimate=pl.CostEstimate(
            flops=flops, transcendentals=0, bytes_accessed=bytes_accessed),
    )(*flat_in)

    if keep_padded or out_pad_last == out_dim:
        return out
    # NOTE: this slice is an extra output-side HBM pass if XLA can't fuse it into the
    # consumer; pass keep_padded=True to hand the lane-dense (B, out_pad) array downstream.
    return out[:, :out_dim]


if __name__ == "__main__":
    layers = (256, 128, 64)
    options = 2
    batch = 16

    key = jax.random.PRNGKey(0)
    key, kx, ki = jax.random.split(key, 3)

    x = jax.random.normal(kx, (batch, layers[0]), dtype=jnp.float32)
    idx = jax.random.randint(ki, (batch,), 0, options, dtype=jnp.int32)

    params = init_idxsel_mlp_params(key, layers=layers, options=options)
    # The torch module zero-inits biases; randomize them here so the "bias always option 0"
    # behaviour of forward() is actually exercised by the check.
    rand_bias_params = []
    for (w, b) in params:
        key, kb = jax.random.split(key)
        rand_bias_params.append((w, 0.1 * jax.random.normal(kb, b.shape, jnp.float32)))
    params = rand_bias_params

    # Default block_b=1024 -> tb=8, grid=(2,) at batch=16: exercises the tiled/pipelined path.
    out = idxsel_mlp_forward(x, idx, params)
    out = jax.block_until_ready(out)

    assert out.shape == (batch, layers[-1]), out.shape
    assert out.dtype == jnp.float32, out.dtype

    # Tight check: plain-JAX reference with the SAME bf16 operand casts as the kernel's MXU
    # path (bf16 operands, f32 accumulation, bias option 0 for every sample).
    h_bf = x.astype(jnp.bfloat16)
    for li, (w, b) in enumerate(params):
        wo = w[idx].astype(jnp.bfloat16)
        y = jnp.einsum("bi,bio->bo",
                       h_bf.astype(jnp.float32), wo.astype(jnp.float32),
                       precision=jax.lax.Precision.HIGHEST) + b[0][None, :]
        h_bf = y.astype(jnp.bfloat16) if li + 1 < len(params) else y
    max_err = float(jnp.max(jnp.abs(out - h_bf)))
    assert jnp.allclose(out, h_bf, atol=2e-3, rtol=2e-3), max_err

    # Loose semantic sanity check vs the full-f32 torch forward (bf16 rounding tolerance).
    h32 = x
    for (w, b) in params:
        h32 = jnp.einsum("bi,bio->bo", h32, w[idx],
                         precision=jax.lax.Precision.HIGHEST) + b[0][None, :]
    max_err32 = float(jnp.max(jnp.abs(out - h32)))
    assert jnp.allclose(out, h32, atol=1e-1, rtol=5e-2), max_err32

    print("KERNEL_OK")
</pallas_src>

<mosaic_0001>
module attributes {stable_mosaic.version = 11 : i64} {
  func.func @kernel(%arg0: i32, %arg1: memref<8x1xi32, #tpu.memory_space<vmem>>, %arg2: memref<8x256xbf16, #tpu.memory_space<vmem>>, %arg3: memref<256x256xbf16, #tpu.memory_space<vmem>>, %arg4: memref<1x128xf32, #tpu.memory_space<vmem>>, %arg5: memref<128x256xbf16, #tpu.memory_space<vmem>>, %arg6: memref<1x128xf32, #tpu.memory_space<vmem>>, %arg7: memref<8x128xf32, #tpu.memory_space<vmem>>) attributes {dimension_semantics = [#tpu.dimension_semantics<parallel>], iteration_bounds = array<i64: 2>, scalar_prefetch = 0 : i64, scratch_operands = 0 : i64, tpu.core_type = #tpu.core_type<tc>, window_params = [{transform_indices = @transform_0, window_bounds = array<i64: 8, 1>}, {transform_indices = @transform_1, window_bounds = array<i64: 8, 256>}, {pipeline_mode = #tpu.pipeline_mode<synchronous>, transform_indices = @transform_2, window_bounds = array<i64: 256, 256>}, {pipeline_mode = #tpu.pipeline_mode<synchronous>, transform_indices = @transform_3, window_bounds = array<i64: 1, 128>}, {pipeline_mode = #tpu.pipeline_mode<synchronous>, transform_indices = @transform_4, window_bounds = array<i64: 128, 256>}, {pipeline_mode = #tpu.pipeline_mode<synchronous>, transform_indices = @transform_5, window_bounds = array<i64: 1, 128>}, {transform_indices = @transform_6, window_bounds = array<i64: 8, 128>}]} {
    %c0 = arith.constant 0 : index
    %c0_0 = arith.constant 0 : index
    %0 = vector.load %arg1[%c0, %c0_0] : memref<8x1xi32, #tpu.memory_space<vmem>>, vector<8x1xi32>
    %c0_1 = arith.constant 0 : index
    %c0_2 = arith.constant 0 : index
    %1 = vector.load %arg2[%c0_1, %c0_2] : memref<8x256xbf16, #tpu.memory_space<vmem>>, vector<8x256xbf16>
    %c0_3 = arith.constant 0 : index
    %c0_4 = arith.constant 0 : index
    %2 = vector.load %arg3[%c0_3, %c0_4] : memref<256x256xbf16, #tpu.memory_space<vmem>>, vector<256x256xbf16>
    %c0_5 = arith.constant 0 : index
    %c0_6 = arith.constant 0 : index
    %3 = vector.load %arg4[%c0_5, %c0_6] : memref<1x128xf32, #tpu.memory_space<vmem>>, vector<1x128xf32>
    %cst = arith.constant dense<0.000000e+00> : vector<8x256xf32>
    %4 = tpu.matmul %1, %2, %cst {dimension_numbers = #tpu.dot_dimension_numbers<[1], [0], [0], [1], [0, 0, 1, 1], [], []>} : vector<8x256xbf16>, vector<256x256xbf16>, vector<8x256xf32> -> vector<8x256xf32>
    %5 = vector.extract_strided_slice %4 {offsets = [0, 0], sizes = [8, 128], strides = [1, 1]} : vector<8x256xf32> to vector<8x128xf32>
    %c1_i32 = arith.constant 1 : i32
    %6 = vector.broadcast %c1_i32 : i32 to vector<8x1xi32>
    %7 = arith.cmpi eq, %0, %6 : vector<8x1xi32>
    %8 = vector.extract_strided_slice %4 {offsets = [0, 128], sizes = [8, 128], strides = [1, 1]} : vector<8x256xf32> to vector<8x128xf32>
    %9 = vector.shape_cast %7 : vector<8x1xi1> to vector<8x1xi1>
    %10 = vector.broadcast %9 : vector<8x1xi1> to vector<8x128xi1>
    %11 = arith.select %10, %8, %5 : vector<8x128xi1>, vector<8x128xf32>
    %12 = vector.broadcast %3 : vector<1x128xf32> to vector<8x128xf32>
    %13 = arith.addf %11, %12 : vector<8x128xf32>
    %14 = arith.truncf %13 : vector<8x128xf32> to vector<8x128xbf16>
    %c0_7 = arith.constant 0 : index
    %c0_8 = arith.constant 0 : index
    %15 = vector.load %arg5[%c0_7, %c0_8] : memref<128x256xbf16, #tpu.memory_space<vmem>>, vector<128x256xbf16>
    %c0_9 = arith.constant 0 : index
    %c0_10 = arith.constant 0 : index
    %16 = vector.load %arg6[%c0_9, %c0_10] : memref<1x128xf32, #tpu.memory_space<vmem>>, vector<1x128xf32>
    %cst_11 = arith.constant dense<0.000000e+00> : vector<8x256xf32>
    %17 = tpu.matmul %14, %15, %cst_11 {dimension_numbers = #tpu.dot_dimension_numbers<[1], [0], [0], [1], [0, 0, 1, 1], [], []>} : vector<8x128xbf16>, vector<128x256xbf16>, vector<8x256xf32> -> vector<8x256xf32>
    %18 = vector.extract_strided_slice %17 {offsets = [0, 0], sizes = [8, 128], strides = [1, 1]} : vector<8x256xf32> to vector<8x128xf32>
    %c1_i32_12 = arith.constant 1 : i32
    %19 = vector.broadcast %c1_i32_12 : i32 to vector<8x1xi32>
    %20 = arith.cmpi eq, %0, %19 : vector<8x1xi32>
    %21 = vector.extract_strided_slice %17 {offsets = [0, 128], sizes = [8, 128], strides = [1, 1]} : vector<8x256xf32> to vector<8x128xf32>
    %22 = vector.shape_cast %20 : vector<8x1xi1> to vector<8x1xi1>
    %23 = vector.broadcast %22 : vector<8x1xi1> to vector<8x128xi1>
    %24 = arith.select %23, %21, %18 : vector<8x128xi1>, vector<8x128xf32>
    %25 = vector.broadcast %16 : vector<1x128xf32> to vector<8x128xf32>
    %26 = arith.addf %24, %25 : vector<8x128xf32>
    %c0_13 = arith.constant 0 : index
    %c0_14 = arith.constant 0 : index
    %27 = vector.load %arg7[%c0_13, %c0_14] : memref<8x128xf32, #tpu.memory_space<vmem>>, vector<8x128xf32>
    tpu.vector_store %arg7[%c0_13, %c0_14], %26 {strides = array<i32>} : memref<8x128xf32, #tpu.memory_space<vmem>>, vector<8x128xf32>,
    return
  }
  func.func @transform_0(%arg0: i32) -> (i32, i32) {
    %c0_i32 = arith.constant 0 : i32
    %c0_i32_0 = arith.constant 0 : i32
    return %arg0, %c0_i32 : i32, i32
  }
  func.func @transform_1(%arg0: i32) -> (i32, i32) {
    %c0_i32 = arith.constant 0 : i32
    %c0_i32_0 = arith.constant 0 : i32
    return %arg0, %c0_i32 : i32, i32
  }
  func.func @transform_2(%arg0: i32) -> (i32, i32) {
    %c0_i32 = arith.constant 0 : i32
    %c0_i32_0 = arith.constant 0 : i32
    %c0_i32_1 = arith.constant 0 : i32
    return %c0_i32, %c0_i32_0 : i32, i32
  }
  func.func @transform_3(%arg0: i32) -> (i32, i32) {
    %c0_i32 = arith.constant 0 : i32
    %c0_i32_0 = arith.constant 0 : i32
    %c0_i32_1 = arith.constant 0 : i32
    return %c0_i32, %c0_i32_0 : i32, i32
  }
  func.func @transform_4(%arg0: i32) -> (i32, i32) {
    %c0_i32 = arith.constant 0 : i32
    %c0_i32_0 = arith.constant 0 : i32
    %c0_i32_1 = arith.constant 0 : i32
    return %c0_i32, %c0_i32_0 : i32, i32
  }
  func.func @transform_5(%arg0: i32) -> (i32, i32) {
    %c0_i32 = arith.constant 0 : i32
    %c0_i32_0 = arith.constant 0 : i32
    %c0_i32_1 = arith.constant 0 : i32
    return %c0_i32, %c0_i32_0 : i32, i32
  }
  func.func @transform_6(%arg0: i32) -> (i32, i32) {
    %c0_i32 = arith.constant 0 : i32
    %c0_i32_0 = arith.constant 0 : i32
    return %arg0, %c0_i32 : i32, i32
  }
}

</mosaic_0001>

<bundles_post_ra>
// kernel: idxsel_mlp_forward.1
= control target key start
LH: loop header
LB: loop body
LE: loop exit
PB: predicated region body
PF: predicated region fallthrough
CT: control target
= control target key end

     0   :  { %11 = vsyncpa [#allocation3], 0  ;;  %s1300_s0 = inlined_call_operand.vmem [shape: s32[16,1], index: 0, kind: input, shape index: {}]   ;;  %s1301_s1 = inlined_call_operand.vmem [shape: bf16[16,256], index: 1, kind: input, shape index: {}]   ;;  %s1302_s2 = inlined_call_operand.vmem [shape: bf16[256,256], index: 2, kind: input, shape index: {}]   ;;  %s1303_s3 = inlined_call_operand.vmem [shape: f32[1,128], index: 3, kind: input, shape index: {}]   ;;  %s1304_s4 = inlined_call_operand.vmem [shape: bf16[128,256], index: 4, kind: input, shape index: {}]   ;;  %s1305_s5 = inlined_call_operand.vmem [shape: f32[1,128], index: 5, kind: input, shape index: {}]   ;;  %s1306_s6 = inlined_call_operand.hbm [shape: f32[16,128], index: 6, kind: output, shape index: {}]  }
   0x1   :  { %13 = vsyncpa [#allocation3 + $0x1], 0  ;;  %s1039_s21 = smov 0   ;;  %s1041_s22 = smov 0  }
   0x2   :  { %s1043_s23 = smov 0   ;;  %s1045_s24 = smov 0  }
   0x3 LB: > { %s1060_s25 = sadd.s32 4294967295, %s1000_s24   ;;  %s758_s26 = sadd.s32 4294967294, %s1000_s24   ;;  %s1000_s24 = sphi %s1045_s24, %s1312_s24   ;;  %s996_s23 = sphi %s1043_s23, %s1311_s23   ;;  %s992_s22 = sphi %s1041_s22, %s1310_s22   ;;  %s988_s21 = sphi %s1039_s21, %s1309_s21  }
   0x4   : > { %s1064_s27 = sadd.s32 1, %s1000_s24   ;;  %s162_s28 = sadd.s32 1, %s996_s23 }
   0x5   : > { %s159_s29 = ssub.s32 %s1000_s24, %s1064_s27  ;;  %p172_p0 = scmp.ne.s32.totalorder %s996_s23, %s992_s22 }
   0x6   : > { %p160_p1 = scmp.eq.s32.totalorder %s159_s29, 0  ;;  %p173_p2 = scmp.eq.s32.totalorder %s1060_s25, 1 }
   0x7   : > { %p178_p3 = scmp.ne.s32.totalorder %s992_s22, %s988_s21  ;;  %p179_p4 = scmp.eq.s32.totalorder %s758_s26, 1 }
   0x8   : > { %s1075_s30 = scalar_select %p160_p1, %s996_s23, %s162_s28  }
   0x9   : > { %p1077_p5 = por %p173_p2, %p172_p0  ;;  %p1081_p6 = por %p179_p4, %p178_p3 }
   0xa   : > { %p761_p7 = scmp.ge.s32.totalorder %s1000_s24, 1  ;;  %p224_p8 = scmp.lt.s32.totalorder %s1000_s24, 3 }
   0xc   : > { %p225_p9 = pnand %p761_p7, %p224_p8 }
   0xd   : > { %v864_v0 = vld [vmem:[%s1302_s2 + $0x4] ss:$8 sps:$4 sm:$0xff] (!%p225_p9)   ;;  %v866_v1 = vld [vmem:[%s1302_s2] ss:$8 sps:$4 sm:$0xff] (!%p225_p9)   ;;  %v1002_v2 = vmov (!%p225_p9), 0   ;;  %p258_p10 = scmp.lt.s32.totalorder (!%p225_p9), %s1060_s25, 1 }
   0xe   : > { %228 = sbr.rel (%p225_p9) target bundleno = 527 (0x20f), region = 44  ;;  %863 = vset.pattern.permute.xlu0 (!%p225_p9), %v1002_v2  ;;  %655 = vmatprep.mubr.bf16.mxu1 (!%p225_p9), %v1002_v2  ;;  %v867_v3 = vld [vmem:[%s1302_s2 + $0x14] ss:$8 sps:$4 sm:$0xff] (!%p225_p9)   ;;  %v869_v4 = vld [vmem:[%s1302_s2 + $0x10] ss:$8 sps:$4 sm:$0xff] (!%p225_p9)   ;;  %s255_s11 = sand.u32 (!%p225_p9), 1, %s992_s22  }
   0xf   : > { %470 = vmatprep.subr.bf16.mxu0 (!%p225_p9), %v864_v0  ;;  %v870_v5 = vld [vmem:[%s1302_s2 + $0x24] ss:$8 sps:$4 sm:$0xff] (!%p225_p9)   ;;  %v872_v6 = vld [vmem:[%s1302_s2 + $0x20] ss:$8 sps:$4 sm:$0xff] (!%p225_p9)   ;;  %v873_v7 = vld [vmem:[%s1302_s2 + $0x34] ss:$8 sps:$4 sm:$0xff] (!%p225_p9)  }
  0x10   : > { %471 = vmatpush1.bf16.msra.mxu0 (!%p225_p9), %v866_v1  ;;  %v875_v8 = vld [vmem:[%s1302_s2 + $0x30] ss:$8 sps:$4 sm:$0xff] (!%p225_p9)   ;;  %v876_v9 = vld [vmem:[%s1302_s2 + $0x44] ss:$8 sps:$4 sm:$0xff] (!%p225_p9)   ;;  %v878_v10 = vld [vmem:[%s1302_s2 + $0x40] ss:$8 sps:$4 sm:$0xff] (!%p225_p9)  }
  0x11   : > { %472 = vmatprep.subr.bf16.mxu0 (!%p225_p9), %v867_v3  ;;  %v879_v11 = vld [vmem:[%s1302_s2 + $0x54] ss:$8 sps:$4 sm:$0xff] (!%p225_p9)   ;;  %v881_v12 = vld [vmem:[%s1302_s2 + $0x50] ss:$8 sps:$4 sm:$0xff] (!%p225_p9)   ;;  %v882_v13 = vld [vmem:[%s1302_s2 + $0x64] ss:$8 sps:$4 sm:$0xff] (!%p225_p9)  }
  0x12   : > { %v884_v14 = vld [vmem:[%s1302_s2 + $0x60] ss:$8 sps:$4 sm:$0xff] (!%p225_p9)   ;;  %v914_v18 = vld [vmem:[%s1304_s4 + $0x4] ss:$8 sps:$4 sm:$0xff] (!%p225_p9)   ;;  %v885_v21 = vld [vmem:[%s1302_s2 + $0x74] ss:$8 sps:$4 sm:$0xff] (!%p225_p9)  }
  0x13   : > { %v916_v20 = vld [vmem:[%s1304_s4] ss:$8 sps:$4 sm:$0xff] (!%p225_p9)   ;;  %v917_v22 = vld [vmem:[%s1304_s4 + $0x14] ss:$8 sps:$4 sm:$0xff] (!%p225_p9)   ;;  %v887_v23 = vld [vmem:[%s1302_s2 + $0x70] ss:$8 sps:$4 sm:$0xff] (!%p225_p9)   ;;  %623 = vmatprep.subr.bf16.mxu1 (!%p225_p9), %v914_v18 }
  0x14   : > { %473 = vmatpush1.bf16.msra.mxu0 (!%p225_p9), %v869_v4  ;;  %624 = vmatpush1.bf16.msra.mxu1 (!%p225_p9), %v916_v20  ;;  %v919_v24 = vld [vmem:[%s1304_s4 + $0x10] ss:$8 sps:$4 sm:$0xff] (!%p225_p9)   ;;  %v920_v25 = vld [vmem:[%s1304_s4 + $0x24] ss:$8 sps:$4 sm:$0xff] (!%p225_p9)   ;;  %v890_v27 = vld [vmem:[%s1302_s2 + $0x80] ss:$8 sps:$4 sm:$0xff] (!%p225_p9)  }
  0x15   : > { %474 = vmatprep.subr.bf16.mxu0 %v870_v5  ;;  %s259_s10 = scalar_select %p258_p10, %s1060_s25, 1  ;;  %625 = vmatprep.subr.bf16.mxu1 %v917_v22  ;;  %v888_v26 = vld [vmem:[%s1302_s2 + $0x84] ss:$8 sps:$4 sm:$0xff]   ;;  %v922_v28 = vld [vmem:[%s1304_s4 + $0x20] ss:$8 sps:$4 sm:$0xff]  }
  0x16   : > { %v923_v29 = vld [vmem:[%s1304_s4 + $0x34] ss:$8 sps:$4 sm:$0xff]   ;;  %v925_v31 = vld [vmem:[%s1304_s4 + $0x30] ss:$8 sps:$4 sm:$0xff]   ;;  %v926_v33 = vld [vmem:[%s1304_s4 + $0x44] ss:$8 sps:$4 sm:$0xff]  }
  0x17   : > { %s763_s15 = sshll.u32 %s259_s10, 3  ;;  %v891_v30 = vld [vmem:[%s1302_s2 + $0x94] ss:$8 sps:$4 sm:$0xff]   ;;  %v893_v32 = vld [vmem:[%s1302_s2 + $0x90] ss:$8 sps:$4 sm:$0xff]   ;;  %s762_s10 = sshll.u32 %s255_s11, 3 }
  0x18   : > { %475 = vmatpush1.bf16.msra.mxu0 %v872_v6  ;;  %s266_s20 = scalar_lea.vmem %s1301_s1, %s763_s15  ;;  %s261_s29 = scalar_lea.vmem %s1300_s0, %s763_s15  ;;  %626 = vmatpush1.bf16.msra.mxu1 %v919_v24  ;;  %v894_v34 = vld [vmem:[%s1302_s2 + $0xa4] ss:$8 sps:$4 sm:$0xff]   ;;  %v928_v35 = vld [vmem:[%s1304_s4 + $0x40] ss:$8 sps:$4 sm:$0xff]   ;;  %v929_v37 = vld [vmem:[%s1304_s4 + $0x54] ss:$8 sps:$4 sm:$0xff]  }
  0x19   : > { %476 = vmatprep.subr.bf16.mxu0 %v873_v7  ;;  %v1137_v15 = vld [vmem:[%s266_s20] sm:$0xff]  ;;  %627 = vmatprep.subr.bf16.mxu1 %v920_v25  ;;  %v897_v38 = vld [vmem:[%s1302_s2 + $0xb4] ss:$8 sps:$4 sm:$0xff]   ;;  %v931_v39 = vld [vmem:[%s1304_s4 + $0x50] ss:$8 sps:$4 sm:$0xff]   ;;  %s819_s14 = sshll.u32 %s1060_s25, 7 }
  0x1a   : > { %v268_v16 = vld [vmem:[%s261_s29] sm:$0xff]  ;;  %v767_v17 = vcombine.high %v1137_v15, %v1137_v15  ;;  %v899_v40 = vld [vmem:[%s1302_s2 + $0xb0] ss:$8 sps:$4 sm:$0xff]   ;;  %v903_v44 = vld [vmem:[%s1302_s2 + $0xd4] ss:$8 sps:$4 sm:$0xff]   ;;  %v766_v50 = vcombine.low %v1137_v15, %v1137_v15  ;;  %s257_s15 = scalar_lea.vmem [#allocation2], %s762_s10  ;;  %s1258_s19 = scalar_lea.hbm %s1306_s6, %s819_s14 }
  0x1b   : > { %vm511_vm0 = vcmp.eq.s32.totalorder %v268_v16, 1  ;;  %v896_v36 = vld [vmem:[%s1302_s2 + $0xa0] ss:$8 sps:$4 sm:$0xff]   ;;  %v932_v41 = vld [vmem:[%s1304_s4 + $0x64] ss:$8 sps:$4 sm:$0xff]   ;;  %s687_s16 = sshll.u32 %s257_s15, 4  ;;  %s1260_s16 = int_to_ptr.vmem [resolvable:$true] %s687_s16 }
  0x1c   : > { %477 = vmatpush1.bf16.msra.mxu0 %v875_v8  ;;  %v512_v19 = vsel %vm511_vm0, 1, %v1002_v2  ;;  %502 = vmatprep.mubr.bf16.mxu0 %v767_v17  ;;  %v900_v42 = vld [vmem:[%s1302_s2 + $0xc4] ss:$8 sps:$4 sm:$0xff]   ;;  %v902_v43 = vld [vmem:[%s1302_s2 + $0xc0] ss:$8 sps:$4 sm:$0xff]   ;;  %s674_s25 = scalar_lea.sflag [#allocation3], %s255_s11 }
  0x1d   : > { %478 = vmatprep.subr.bf16.mxu0 %v876_v9  ;;  %514 = vperm.xlu0 %863, %v512_v19   ;;  %v905_v45 = vld [vmem:[%s1302_s2 + $0xd0] ss:$8 sps:$4 sm:$0xff]   ;;  %v906_v46 = vld [vmem:[%s1302_s2 + $0xe4] ss:$8 sps:$4 sm:$0xff]   ;;  %v908_v47 = vld [vmem:[%s1302_s2 + $0xe0] ss:$8 sps:$4 sm:$0xff]  }
  0x1e   : > { %628 = vmatpush1.bf16.msra.mxu1 %v922_v28  ;;  %v909_v48 = vld [vmem:[%s1302_s2 + $0xf4] ss:$8 sps:$4 sm:$0xff]   ;;  %v911_v49 = vld [vmem:[%s1302_s2 + $0xf0] ss:$8 sps:$4 sm:$0xff]   ;;  %v934_v51 = vld [vmem:[%s1304_s4 + $0x60] ss:$8 sps:$4 sm:$0xff]  }
  0x1f   : > { %629 = vmatprep.subr.bf16.mxu1 %v923_v29  ;;  %v935_v52 = vld [vmem:[%s1304_s4 + $0x74] ss:$8 sps:$4 sm:$0xff]   ;;  %v937_v53 = vld [vmem:[%s1304_s4 + $0x70] ss:$8 sps:$4 sm:$0xff]   ;;  %v800_v56 = vld [vmem:[%s1303_s3] ss:$0 sm:$0xff] }
  0x20   : > { %479 = vmatpush1.bf16.msra.mxu0 %v878_v10  ;;  %v817_v0 = vld [vmem:[%s1305_s5] ss:$0 sm:$0xff]  ;;  %s938_s26 = scalar_lea.vmem %s1260_s16, 128  ;;  %s1003_s20 = smov [#allocation2]  }
  0x21   : > { %480 = vmatprep.subr.bf16.mxu0 %v879_v11  ;;  %p939_p11 = scmp.ne.s32.totalorder %s1260_s16, %s938_s26  ;;  %s942_s28 = sshll.u32 %s1003_s20, 4  ;;  %s943_s28 = int_to_ptr.vmem [resolvable:$false] %s942_s28 }
  0x22   : > { %630 = vmatpush1.bf16.msra.mxu1 %v925_v31  ;;  %s944_s29 = scalar_lea.vmem %s943_s28, 256  ;;  %p945_p0 = scmp.lt.s32.totalorder %s1260_s16, %s943_s28 }
  0x23   : > { %631 = vmatprep.subr.bf16.mxu1 %v926_v33  ;;  %p940_p12 = pnand %p939_p11, %p1077_p5  ;;  %p946_p1 = scmp.lt.s32.totalorder %s944_s29, %s938_s26 }
  0x24   : > { %481 = vmatpush1.bf16.msra.mxu0 %v881_v12 }
  0x25   : > { %482 = vmatprep.subr.bf16.mxu0 %v882_v13  ;;  %p941_p13 = pneg %p940_p12  ;;  %p947_p2 = por %p946_p1, %p945_p0 }
  0x26   : > { %632 = vmatpush1.bf16.msra.mxu1 %v928_v35 }
  0x27   : > { %633 = vmatprep.subr.bf16.mxu1 %v929_v37  ;;  %p948_p3 = pnand %p947_p2, %p941_p13 }
  0x28   : > { %483 = vmatpush1.bf16.msra.mxu0 %v884_v14 }
  0x29   : > { %484 = vmatprep.subr.bf16.mxu0 %v885_v21 }
  0x2a   : > { %634 = vmatpush1.bf16.msra.mxu1 %v931_v39 }
  0x2b   : > { %635 = vmatprep.subr.bf16.mxu1 %v932_v41 }
  0x2c   : > { %485 = vmatpush1.bf16.msra.mxu0 %v887_v23 }
  0x2d   : > { %486 = vmatprep.subr.bf16.mxu0 %v888_v26 }
  0x2e   : > { %636 = vmatpush1.bf16.msra.mxu1 %v934_v51 }
  0x2f   : > { %637 = vmatprep.subr.bf16.mxu1 %v935_v52 }
  0x30   : > { %487 = vmatpush1.bf16.msra.mxu0 %v890_v27 }
  0x31   : > { %488 = vmatprep.subr.bf16.mxu0 %v891_v30 }
  0x32   : > { %638 = vmatpush1.bf16.msra.mxu1 %v937_v53 }
  0x34   : > { %489 = vmatpush1.bf16.msra.mxu0 %v893_v32 }
  0x35   : > { %490 = vmatprep.subr.bf16.mxu0 %v894_v34 }
  0x38   : > { %491 = vmatpush1.bf16.msra.mxu0 %v896_v36 }
  0x39   : > { %492 = vmatprep.subr.bf16.mxu0 %v897_v38 }
  0x3c   : > { %493 = vmatpush1.bf16.msra.mxu0 %v899_v40 }
  0x3d   : > { %494 = vmatprep.subr.bf16.mxu0 %v900_v42 }
  0x40   : > { %495 = vmatpush1.bf16.msra.mxu0 %v902_v43 }
  0x41   : > { %496 = vmatprep.subr.bf16.mxu0 %v903_v44 }
  0x44   : > { %497 = vmatpush1.bf16.msra.mxu0 %v905_v45 }
  0x45   : > { %498 = vmatprep.subr.bf16.mxu0 %v906_v46 }
  0x48   : > { %499 = vmatpush1.bf16.msra.mxu0 %v908_v47 }
  0x49   : > { %500 = vmatprep.subr.bf16.mxu0 %v909_v48 }
  0x4c   : > { %501 = vmatpush1.bf16.msra.mxu0 %v911_v49 }
  0x4f   : > { %503 = vmatmul.mubr.bf16.vlgmr.msra.gmra.mrb[0].mxu0 %v766_v50 }
  0x9c   : > { %v515_v54 = vpop.permute.xlu0 %514 }
  0x9d   : > { %vm516_vm1 = vcmp.eq.s32.totalorder %v515_v54, 1 }
 0x122   : > { %v504_v55 = vpop.f32.mrb[0].mxu0 }
 0x123   : > { %v506_v57 = vpop.f32.mrb[1].mxu0 }
 0x124   : > { %v517_v58 = vsel %vm516_vm1, %v506_v57, %v504_v55  ;;  %v508_v59 = vpop.f32.mrb[2].mxu0 }
 0x125   : > { %v524_v60 = vadd.f32 %v800_v56, %v517_v58  ;;  %v509_v61 = vpop.f32.mrb[3].mxu0 }
 0x127   : > { %v525_v62 = vpack.c.bf16 %v524_v60, %v524_v60 }
 0x129   : > { %656 = vmatmul.mubr.bf16.vlgmr.msra.gmra.mrb[0].mxu1 %v525_v62 }
 0x1fc   : > { %v657_v63 = vpop.f32.mrb[0].mxu1 }
 0x1fd   : > { %v659_v1 = vpop.f32.mrb[1].mxu1 }
 0x1fe   : > { %v664_v2 = vsel %vm516_vm1, %v659_v1, %v657_v63  ;;  %v661_v3 = vpop.f32.mrb[2].mxu1 }
 0x1ff   : > { %v671_v4 = vadd.f32 %v817_v0, %v664_v2  ;;  %v662_v5 = vpop.f32.mrb[3].mxu1 }
 0x201   : > { %672 = vst [vmem:[%s257_s15] sm:$0xff] %v671_v4 }
 0x202   : > { %951 = shalt.err (!%p948_p3)
}
 0x203   : > { %s952_s9 = scalar_lea.hbm %s1258_s19, 128  ;;  %s956_s12 = scalar_lea.hbm %s1306_s6, 256 }
 0x204   : > { %p953_p4 = scmp.ne.s32.totalorder %s1258_s19, %s952_s9  ;;  %p957_p9 = scmp.lt.u32.totalorder %s1258_s19, %s1306_s6 }
 0x205   : > { %p958_p10 = scmp.lt.u32.totalorder %s956_s12, %s952_s9  ;;  %p960_p12 = scmp.lt.u32.totalorder %s952_s9, %s1258_s19 }
 0x206   : > { %p954_p7 = pnand %p953_p4, %p1077_p5 }
 0x207   : > { %p959_p11 = por %p958_p10, %p957_p9 }
 0x208   : > { %p955_p8 = pneg %p954_p7 }
 0x209   : > { %p961_p13 = por %p960_p12, %p959_p11 }
 0x20b   : > { %p962_p0 = pnand %p961_p13, %p955_p8 }
 0x20d   : > { %965 = shalt.err (!%p962_p0)
}
 0x20e   : > { %823 = dma.vmem_to_hbm [thread:$0]  (%p1077_p5), %s1260_s16, 128, %s1258_s19, %s674_s25  }
 0x20f PF: > { %p829_p1 = scmp.ge.s32.totalorder %s1000_s24, 2  ;;  %s699_s15 = sand.u32 1, %s988_s21  }
 0x210   : > { %s700_s17 = scalar_lea.sflag [#allocation3], %s699_s15 }
 0x211   : > { %p826_p2 = pnand %p829_p1, %p1081_p6 }
 0x213   : > { %983 = dma.done.wait (!%p826_p2), %s700_s17, 128  }
 0x214   : > { %985 = vsyncadd (!%p826_p2), %s700_s17, 4294967168  ;;  %p16_p3 = scmp.ge.s32.totalorder %s1064_s27, 4   ;;  %s1309_s21 = smov %s992_s22 }
 0x215   : > { %s1310_s22 = smov %s996_s23  ;;  %s1311_s23 = smov %s1075_s30 }
 0x216   : > { %s1312_s24 = smov %s1064_s27  ;;  %18 = sbr.rel (!%p16_p3) target bundleno = 3 (0x3), region = 82 }
 0x21d   :  { %705 = vsyncpa [#allocation3], 1 }
 0x21e   :  { %707 = vsyncpa [#allocation3 + $0x1], 1 }

</bundles_post_ra>
